<compile_context>
chip_gen: v5e
topology: v5e:2x2
jax: 0.10.0
libtpu: 0.0.40
codegen_flags: <defaults>
</compile_context>

<pallas_src>
import functools

import jax
import jax.numpy as jnp
from jax.experimental import pallas as pl
from jax.experimental.pallas import tpu as pltpu


def _patch_proj_kernel(x_ref, w_ref, b_ref, o_ref):
    # x_ref: (TILE_M, K)  patch tile
    # w_ref: (K, E)       flattened conv weight (resident across grid steps)
    # b_ref: (1, E)       bias (f32, resident)
    # o_ref: (TILE_M, E)
    acc = jnp.dot(x_ref[...], w_ref[...], preferred_element_type=jnp.float32)
    acc = acc + b_ref[...]          # broadcast (1, E) over TILE_M, f32
    o_ref[...] = acc.astype(o_ref.dtype)


def patch_embed_2d(x, weight, bias, patch_size, *, tile_m=512,
                   compute_dtype=None):
    """x: (B, C, H, W).  weight: (E, C, ph, pw).  bias: (E,).

    Returns (B, Hp, Wp, E) == proj(x).permute(0, 2, 3, 1) (norm_layer=None).
    compute_dtype: optionally bf16 to halve LHS DMA bytes / use native MXU
    rate on v6e/v7x (accumulation stays f32).
    """
    B, C, H, W = x.shape
    E = weight.shape[0]
    ph, pw = patch_size
    assert H % ph == 0 and W % pw == 0, "H, W must be divisible by patch_size"
    Hp, Wp = H // ph, W // pw
    M = B * Hp * Wp
    K = C * ph * pw

    out_dtype = x.dtype
    if compute_dtype is None:
        compute_dtype = x.dtype

    # Patch extraction in (C, kh, kw) flatten order to match PyTorch OIHW
    # weights:  (B,C,H,W) -> (B,C,Hp,ph,Wp,pw) -> (B,Hp,Wp,C,ph,pw) -> (M,K)
    patches = (x.reshape(B, C, Hp, ph, Wp, pw)
                 .transpose(0, 2, 4, 1, 3, 5)
                 .reshape(M, K)
                 .astype(compute_dtype))
    # Flatten conv weight: (E, C, ph, pw) -> (E, K) -> (K, E)
    w_mat = weight.reshape(E, K).T.astype(compute_dtype)
    b_mat = bias.reshape(1, E).astype(jnp.float32)

    # ---- M tiling ---------------------------------------------------------
    # Small problems: a single block equal to the full dims (always a legal
    # layout).  Large problems: fixed TILE_M (multiple of 8), pad M up so the
    # grid divides evenly; weight/bias index_maps are constant so those tiles
    # stay resident in VMEM across all grid steps.
    if M <= tile_m:
        tm = M
    else:
        tm = tile_m
    m_pad = pl.cdiv(M, tm) * tm
    if m_pad != M:
        patches = jnp.pad(patches, ((0, m_pad - M), (0, 0)))
    grid_m = m_pad // tm

    # ---- explicit scoped-VMEM budget (double-buffered tiles + residents) --
    in_bytes = jnp.dtype(compute_dtype).itemsize
    out_bytes = jnp.dtype(out_dtype).itemsize
    vmem_need = (2 * tm * K * in_bytes          # patches tile, double-buffered
                 + 2 * K * E * in_bytes         # resident weight (+slack)
                 + 2 * E * 4                    # bias
                 + 2 * tm * E * out_bytes)      # output tile, double-buffered
    vmem_limit = int(min(max(vmem_need + (4 << 20), 16 << 20), 64 << 20))

    cost = pl.CostEstimate(
        flops=2 * m_pad * K * E,
        transcendentals=0,
        bytes_accessed=(m_pad * K * in_bytes + K * E * in_bytes
                        + E * 4 + m_pad * E * out_bytes),
    )

    out = pl.pallas_call(
        _patch_proj_kernel,
        out_shape=jax.ShapeDtypeStruct((m_pad, E), out_dtype),
        grid_spec=pltpu.PrefetchScalarGridSpec(
            num_scalar_prefetch=0,
            grid=(grid_m,),
            in_specs=[
                pl.BlockSpec((tm, K), lambda i: (i, 0)),   # patch tile
                pl.BlockSpec((K, E), lambda i: (0, 0)),    # resident weight
                pl.BlockSpec((1, E), lambda i: (0, 0)),    # resident bias
            ],
            out_specs=pl.BlockSpec((tm, E), lambda i: (i, 0)),
        ),
        compiler_params=pltpu.CompilerParams(
            dimension_semantics=("parallel",),   # independent M tiles -> 2 TCs on v7x
            vmem_limit_bytes=vmem_limit,
        ),
        cost_estimate=cost,
    )(patches, w_mat, b_mat)

    if m_pad != M:
        out = out[:M]
    # Equivalent of proj(x).permute(0, 2, 3, 1): (B, Hp, Wp, E)
    return out.reshape(B, Hp, Wp, E)


if __name__ == "__main__":
    # Small shapes consistent with the module.
    B, C, H, W = 2, 4, 16, 16
    patch = (4, 4)
    embed_dim = 32

    key = jax.random.PRNGKey(0)
    kx, kw, kb = jax.random.split(key, 3)

    x = jax.random.normal(kx, (B, C, H, W), dtype=jnp.float32)
    # Deterministic synthetic parameters (no checkpoint load).
    fan_in = C * patch[0] * patch[1]
    bound = 1.0 / (fan_in ** 0.5)
    weight = jax.random.uniform(kw, (embed_dim, C, patch[0], patch[1]),
                                minval=-bound, maxval=bound, dtype=jnp.float32)
    bias = jax.random.uniform(kb, (embed_dim,),
                              minval=-bound, maxval=bound, dtype=jnp.float32)

    # norm_layer=None in the default module -> no norm applied.
    fwd = jax.jit(functools.partial(patch_embed_2d, patch_size=patch))
    out = jax.block_until_ready(fwd(x, weight, bias))

    # Reference check against lax conv (same semantics as nn.Conv2d).
    ref = jax.lax.conv_general_dilated(
        x, weight, window_strides=patch, padding="VALID",
        dimension_numbers=("NCHW", "OIHW", "NCHW"))
    ref = (ref + bias[None, :, None, None]).transpose(0, 2, 3, 1)
    assert out.shape == (B, H // patch[0], W // patch[1], embed_dim)
    assert jnp.allclose(out, ref, atol=1e-4, rtol=1e-4)

    # Optional bf16 MXU path (v6e/v7x): halves LHS DMA bytes; f32 accumulate.
    out_bf16 = jax.block_until_ready(
        patch_embed_2d(x, weight, bias, patch, compute_dtype=jnp.bfloat16))
    assert jnp.allclose(out_bf16, ref, atol=5e-2, rtol=5e-2)

    print("KERNEL_OK")
</pallas_src>

<mosaic_0001>
module attributes {stable_mosaic.version = 11 : i64} {
  func.func @_patch_proj_kernel(%arg0: i32, %arg1: memref<32x64xf32, #tpu.memory_space<vmem>>, %arg2: memref<64x32xf32, #tpu.memory_space<vmem>>, %arg3: memref<1x32xf32, #tpu.memory_space<vmem>>, %arg4: memref<32x32xf32, #tpu.memory_space<vmem>>) attributes {dimension_semantics = [#tpu.dimension_semantics<parallel>], iteration_bounds = array<i64: 1>, scalar_prefetch = 0 : i64, scratch_operands = 0 : i64, tpu.core_type = #tpu.core_type<tc>, window_params = [{transform_indices = @transform_0, window_bounds = array<i64: 32, 64>}, {pipeline_mode = #tpu.pipeline_mode<synchronous>, transform_indices = @transform_1, window_bounds = array<i64: 64, 32>}, {pipeline_mode = #tpu.pipeline_mode<synchronous>, transform_indices = @transform_2, window_bounds = array<i64: 1, 32>}, {transform_indices = @transform_3, window_bounds = array<i64: 32, 32>}]} {
    %c0 = arith.constant 0 : index
    %c0_0 = arith.constant 0 : index
    %0 = vector.load %arg1[%c0, %c0_0] : memref<32x64xf32, #tpu.memory_space<vmem>>, vector<32x64xf32>
    %c0_1 = arith.constant 0 : index
    %c0_2 = arith.constant 0 : index
    %1 = vector.load %arg2[%c0_1, %c0_2] : memref<64x32xf32, #tpu.memory_space<vmem>>, vector<64x32xf32>
    %cst = arith.constant dense<0.000000e+00> : vector<32x32xf32>
    %2 = tpu.matmul %0, %1, %cst {dimension_numbers = #tpu.dot_dimension_numbers<[1], [0], [0], [1], [0, 0, 1, 1], [], []>} : vector<32x64xf32>, vector<64x32xf32>, vector<32x32xf32> -> vector<32x32xf32>
    %c0_3 = arith.constant 0 : index
    %c0_4 = arith.constant 0 : index
    %3 = vector.load %arg3[%c0_3, %c0_4] : memref<1x32xf32, #tpu.memory_space<vmem>>, vector<1x32xf32>
    %4 = vector.broadcast %3 : vector<1x32xf32> to vector<32x32xf32>
    %5 = arith.addf %2, %4 : vector<32x32xf32>
    %c0_5 = arith.constant 0 : index
    %c0_6 = arith.constant 0 : index
    %6 = vector.load %arg4[%c0_5, %c0_6] : memref<32x32xf32, #tpu.memory_space<vmem>>, vector<32x32xf32>
    tpu.vector_store %arg4[%c0_5, %c0_6], %5 {strides = array<i32>} : memref<32x32xf32, #tpu.memory_space<vmem>>, vector<32x32xf32>,
    return
  }
  func.func @transform_0(%arg0: i32) -> (i32, i32) {
    %c0_i32 = arith.constant 0 : i32
    %c0_i32_0 = arith.constant 0 : i32
    return %arg0, %c0_i32 : i32, i32
  }
  func.func @transform_1(%arg0: i32) -> (i32, i32) {
    %c0_i32 = arith.constant 0 : i32
    %c0_i32_0 = arith.constant 0 : i32
    %c0_i32_1 = arith.constant 0 : i32
    return %c0_i32, %c0_i32_0 : i32, i32
  }
  func.func @transform_2(%arg0: i32) -> (i32, i32) {
    %c0_i32 = arith.constant 0 : i32
    %c0_i32_0 = arith.constant 0 : i32
    %c0_i32_1 = arith.constant 0 : i32
    return %c0_i32, %c0_i32_0 : i32, i32
  }
  func.func @transform_3(%arg0: i32) -> (i32, i32) {
    %c0_i32 = arith.constant 0 : i32
    %c0_i32_0 = arith.constant 0 : i32
    return %arg0, %c0_i32 : i32, i32
  }
}

</mosaic_0001>

<bundles_post_ra>
// kernel: patch_embed_2d.1
= control target key start
LH: loop header
LB: loop body
LE: loop exit
PB: predicated region body
PF: predicated region fallthrough
CT: control target
= control target key end

     0   :  { %s223_s0 = inlined_call_operand.vmem [shape: f32[32,64], index: 0, kind: input, shape index: {}]   ;;  %s224_s1 = inlined_call_operand.vmem [shape: f32[64,32], index: 1, kind: input, shape index: {}]   ;;  %s225_s2 = inlined_call_operand.vmem [shape: f32[1,32], index: 2, kind: input, shape index: {}]   ;;  %s226_s3 = inlined_call_operand.hbm [shape: f32[32,32], index: 3, kind: output, shape index: {}]  }
   0x1   :  { %v26_v0 = vld [vmem:[%s224_s1 + $0x38] sm:$0xff]  ;;  %v25_v1 = vld [vmem:[%s224_s1 + $0x30] sm:$0xff]  ;;  %v24_v2 = vld [vmem:[%s224_s1 + $0x28] sm:$0xff] }
   0x2   :  { %101 = vmatpush.msra.mxu2 %v26_v0  ;;  %102 = vmatpush.msra.mxu3 %v26_v0  ;;  %v23_v3 = vld [vmem:[%s224_s1 + $0x20] sm:$0xff] }
   0x3   :  { %52 = vmatpush.msra.mxu0 %v26_v0  ;;  %100 = vmatpush.msra.mxu1 %v26_v0 }
   0x4   :  { %104 = vmatpush.msra.mxu2 %v25_v1  ;;  %105 = vmatpush.msra.mxu3 %v25_v1 }
   0x5   :  { %53 = vmatpush.msra.mxu0 %v25_v1  ;;  %103 = vmatpush.msra.mxu1 %v25_v1 }
   0x6   :  { %8 = vsyncpa [#allocation3], 0  ;;  %107 = vmatpush.msra.mxu2 %v24_v2  ;;  %108 = vmatpush.msra.mxu3 %v24_v2  ;;  %v22_v4 = vld [vmem:[%s224_s1 + $0x18] sm:$0xff]  ;;  %v21_v5 = vld [vmem:[%s224_s1 + $0x10] sm:$0xff]  ;;  %vm31_vm0 = vcmask 523264   ;;  %vm73_vm1 = vcmask 261120  }
   0x7   :  { %54 = vmatpush.msra.mxu0 %v24_v2  ;;  %106 = vmatpush.msra.mxu1 %v24_v2  ;;  %v20_v6 = vld [vmem:[%s224_s1 + $0x8] sm:$0xff]  ;;  %v19_v7 = vld [vmem:[%s224_s1] sm:$0xff]  ;;  %v17_v8 = vld [vmem:[%s223_s0 + $0x10] sm:$0xff]  ;;  %s154_s10 = smov [#allocation2]   ;;  %s156_s14 = smov 8  }
   0x8   :  { %110 = vmatpush.msra.mxu2 %v23_v3  ;;  %111 = vmatpush.msra.mxu3 %v23_v3  ;;  %v18_v9 = vld [vmem:[%s223_s0 + $0x18] sm:$0xff]  ;;  %v15_v10 = vld [vmem:[%s223_s0] sm:$0xff]  ;;  %v16_v11 = vld [vmem:[%s223_s0 + $0x8] sm:$0xff]  ;;  %s82_s11 = sshll.u32 %s154_s10, 4  ;;  %s84_s0 = sshll.u32 %s226_s3, 4  ;;  %s83_s11 = int_to_ptr.vmem [resolvable:$true] %s82_s11  ;;  %s85_s0 = int_to_ptr.hbm [resolvable:$true] %s84_s0 }
   0x9   :  { %55 = vmatpush.msra.mxu0 %v23_v3  ;;  %109 = vmatpush.msra.mxu1 %v23_v3  ;;  %v127_v12 = vld [vmem:[%s225_s2] ss:$0 sm:$0xff]  ;;  %s155_s2 = smov 128  }
   0xa   :  { %113 = vmatpush.msra.mxu2 %v22_v4  ;;  %114 = vmatpush.msra.mxu3 %v22_v4 }
   0xb   :  { %56 = vmatpush.msra.mxu0 %v22_v4  ;;  %112 = vmatpush.msra.mxu1 %v22_v4 }
   0xc   :  { %116 = vmatpush.msra.mxu2 %v21_v5  ;;  %117 = vmatpush.msra.mxu3 %v21_v5 }
   0xd   :  { %57 = vmatpush.msra.mxu0 %v21_v5  ;;  %115 = vmatpush.msra.mxu1 %v21_v5 }
   0xe   :  { %119 = vmatpush.msra.mxu2 %v20_v6  ;;  %120 = vmatpush.msra.mxu3 %v20_v6 }
   0xf   :  { %58 = vmatpush.msra.mxu0 %v20_v6  ;;  %118 = vmatpush.msra.mxu1 %v20_v6 }
  0x10   :  { %122 = vmatpush.msra.mxu2 %v19_v7  ;;  %123 = vmatpush.msra.mxu3 %v19_v7 }
  0x11   :  { %98 = vmatmul.msk.f32.vlgmr.msra.gmra.mxu2 %vm31_vm0, %v17_v8  ;;  %99 = vmatmul.msk.f32.vlgmr.msra.gmra.mxu3 %vm31_vm0, %v18_v9 }
  0x12   :  { %59 = vmatpush.msra.mxu0 %v19_v7  ;;  %121 = vmatpush.msra.mxu1 %v19_v7 }
  0x13   :  { %96 = vmatmul.msk.f32.vlgmr.msra.gmra.mxu0 %vm31_vm0, %v15_v10  ;;  %97 = vmatmul.msk.f32.vlgmr.msra.gmra.mxu1 %vm31_vm0, %v16_v11 }
  0x90   :  { %v61_v13 = vpop.f32.mrf.mxu0  ;;  %v64_v14 = vpop.f32.mrf.mxu1 }
  0x91   :  { %v62_v15 = vadd.f32 %v127_v12, %v61_v13  ;;  %v65_v16 = vadd.f32 %v127_v12, %v64_v14 }
  0x93   :  { %74 = vst.msk [vmem:[#allocation2] sm:$0xff] %vm73_vm1, %v62_v15 }
  0x94   :  { %75 = vst.msk [vmem:[#allocation2 + $0x8] sm:$0xff] %vm73_vm1, %v65_v16  ;;  %v67_v17 = vpop.f32.mrf.mxu2  ;;  %v70_v18 = vpop.f32.mrf.mxu3 }
  0x95   :  { %v68_v19 = vadd.f32 %v127_v12, %v67_v17  ;;  %v71_v20 = vadd.f32 %v127_v12, %v70_v18 }
  0x97   :  { %76 = vst.msk [vmem:[#allocation2 + $0x10] sm:$0xff] %vm73_vm1, %v68_v19 }
  0x98   :  { %77 = vst.msk [vmem:[#allocation2 + $0x18] sm:$0xff] %vm73_vm1, %v71_v20 }
  0x99   :  { %90 = dma.vmem_to_hbm [thread:$0]  %s83_s11, 512, %s85_s0, [#allocation3], %s155_s2, %s155_s2, %s156_s14  }
  0x9a   :  { %152 = dma.done.wait [#allocation3], 512  }
  0x9b   :  { %153 = vsyncadd [#allocation3], 4294966784 }
  0x9c   :  { %95 = vsyncpa [#allocation3], 1 }

</bundles_post_ra>
